<compile_context>
chip_gen: v5e
topology: v5e:2x2
jax: 0.10.0
libtpu: 0.0.40
codegen_flags: <defaults>
</compile_context>

<pallas_src>
import functools

import jax
import jax.numpy as jnp
from jax import lax
from jax.experimental import pallas as pl
from jax.experimental.pallas import tpu as pltpu

WINDOW_SIZE = 2  # matches module-level `window_size = 2`


def _window_mlp_kernel(tok_ref, wcat_ref, b1_ref, w2_ref, b2_ref, out_ref,
                       *, fw, v_pad):
    """One grid step = TILE_B packed batch rows (L = TILE_B * S lanes).

    tok_ref : (fw, L)         int32  tokens left-shifted by o, one row per offset
    wcat_ref: (H, fw*v_pad)   bf16   folded (embedding-table x layer-1) weights
    b1_ref  : (H, 1)          f32
    w2_ref  : (H, 1)          f32    layer-2 weights as a column
    b2_ref  : (1, 1)          f32    scalar in SMEM
    out_ref : (1, L)          f32    lane-dense output row (>=128 lanes)
    """
    L = tok_ref.shape[-1]
    tok = tok_ref[...]                                           # (fw, L) int32
    viota = lax.broadcasted_iota(jnp.int32, (v_pad, L), 0)       # vocab ids

    # Stacked one-hot RHS: sublane block o holds onehot(tokens shifted by o).
    # Wrap-around garbage only lands in per-row tail lanes (j >= nw), which
    # the wrapper discards.
    blocks = [(viota == tok[o:o + 1, :]).astype(jnp.bfloat16) for o in range(fw)]
    onehot = jnp.concatenate(blocks, axis=0)                     # (fw*v_pad, L) bf16

    # Fused gather + layer 1: a single K = fw*v_pad MXU matmul, f32 accumulation.
    acc = jnp.dot(wcat_ref[...], onehot,
                  preferred_element_type=jnp.float32)            # (H, L) f32

    h = jnp.tanh(acc + b1_ref[...])                              # f32 (EUP tanh)
    # Layer 2 (H -> 1): VPU multiply + sublane reduce (no N=1 MXU matmul);
    # result is already a lane-dense row.
    logits = jnp.sum(h * w2_ref[...], axis=0, keepdims=True) + b2_ref[0, 0]
    out_ref[...] = jax.nn.sigmoid(logits)                        # unmasked 128-lane store


def network_forward(tokens, embed_table, w1, b1, w2, b2, window_size=WINDOW_SIZE):
    """JAX/Pallas equivalent of Network.forward.

    tokens: (B, S) int32 token ids.
    Returns: (B, S - 2*window_size) float32 probabilities.
    """
    B, S = tokens.shape
    fw = 2 * window_size + 1
    nw = S - 2 * window_size
    V, E = embed_table.shape
    H = w1.shape[1]

    # Pack TILE_B rows per grid step so each MXU push / store covers >=128
    # lanes; pad the batch with pad tokens (table row 0 is zero).
    TILE_B = max(1, pl.cdiv(128, S))
    G = pl.cdiv(B, TILE_B)
    B_pad = G * TILE_B
    L = TILE_B * S

    tok_pad = jnp.pad(tokens.astype(jnp.int32), ((0, B_pad - B), (0, 0)))
    tok_flat = tok_pad.reshape(G, 1, L)                          # lane = b_in_tile*S + j
    # tok_shift[g, o, l] = token at lane (l + o) mod L; wrap-around only hits
    # the discarded tail lanes j >= nw of each row.
    tok_shift = jnp.concatenate(
        [jnp.roll(tok_flat, -o, axis=-1) for o in range(fw)], axis=1)   # (G, fw, L)

    # Fold the embedding table into layer 1: Wv[o][h, v] = sum_e T[v,e] W1[o,e,h].
    # Exact algebra ((W1^T T^T) onehot == W1^T (T^T onehot)); the E-contraction
    # stays f32 and only the folded weight is rounded to bf16.
    # TODO(synk): for large vocabularies, replace the folded (fw, H, V) weight /
    # one-hot matmul with an in-kernel row gather of a VMEM-resident table
    # (scalar-prefetched token ids).
    v_pad = ((V + 15) // 16) * 16                                # bf16 sublane tile multiple
    w1_blocks = w1.reshape(fw, E, H)                             # offset-major, matches unfold
    wv = jnp.einsum('ve,oeh->ohv', embed_table, w1_blocks)       # (fw, H, V) f32
    wv = jnp.pad(wv, ((0, 0), (0, 0), (0, v_pad - V)))
    w_cat = jnp.transpose(wv, (1, 0, 2)).reshape(H, fw * v_pad).astype(jnp.bfloat16)

    b1_col = b1.reshape(H, 1).astype(jnp.float32)
    w2_col = w2.reshape(H, 1).astype(jnp.float32)
    b2_scalar = b2.reshape(1, 1).astype(jnp.float32)

    cost = pl.CostEstimate(
        flops=2 * G * H * (fw * v_pad) * L + 4 * G * H * L,
        transcendentals=G * L * (H + 1),
        bytes_accessed=(tok_shift.size * 4 + w_cat.size * 2
                        + G * L * 4 + (2 * H + 1) * 4),
    )

    kernel = functools.partial(_window_mlp_kernel, fw=fw, v_pad=v_pad)

    # VMEM footprint here is a few hundred KB; if scaled up (real V/E/S),
    # budget against v7x's 64 MiB/TC and set vmem_limit_bytes explicitly.
    out = pl.pallas_call(
        kernel,
        out_shape=jax.ShapeDtypeStruct((G, 1, L), jnp.float32),
        grid_spec=pltpu.PrefetchScalarGridSpec(
            num_scalar_prefetch=0,
            grid=(G,),                                             # 1 step at toy sizes
            in_specs=[
                pl.BlockSpec((None, fw, L), lambda g: (g, 0, 0)),   # shifted tokens
                pl.BlockSpec((H, fw * v_pad), lambda g: (0, 0)),    # folded weights (resident)
                pl.BlockSpec((H, 1), lambda g: (0, 0)),             # b1 column
                pl.BlockSpec((H, 1), lambda g: (0, 0)),             # w2 column
                pl.BlockSpec(memory_space=pltpu.MemorySpace.SMEM),  # b2 scalar
            ],
            out_specs=pl.BlockSpec((None, 1, L), lambda g: (g, 0, 0)),
        ),
        compiler_params=pltpu.CompilerParams(
            dimension_semantics=("parallel",),   # row groups shard across TCs (v7x)
        ),
        cost_estimate=cost,
    )(tok_shift, w_cat, b1_col, w2_col, b2_scalar)

    # Lanes are (row-in-tile, position); keep the first nw positions per row.
    return out.reshape(B_pad, S)[:B, :nw]


if __name__ == "__main__":
    # Small hyperparameters consistent with the module.
    vocab_size = 50
    embed_dim = 32
    hidden_dim = 32
    batch = 2
    sent_len = 16
    pad_ix = 0
    fw = 2 * WINDOW_SIZE + 1
    nw = sent_len - 2 * WINDOW_SIZE

    key = jax.random.PRNGKey(0)
    k_emb, k_w1, k_b1, k_w2, k_b2, k_tok = jax.random.split(key, 6)

    # Deterministic parameter init (padding row zeroed, like padding_idx=0).
    embed_table = 0.1 * jax.random.normal(k_emb, (vocab_size, embed_dim), jnp.float32)
    embed_table = embed_table.at[pad_ix].set(0.0)

    in_dim = fw * embed_dim
    lim1 = 1.0 / jnp.sqrt(in_dim)
    lim2 = 1.0 / jnp.sqrt(hidden_dim)
    w1 = jax.random.uniform(k_w1, (in_dim, hidden_dim), jnp.float32, -lim1, lim1)
    b1 = jax.random.uniform(k_b1, (1, hidden_dim), jnp.float32, -lim1, lim1)
    w2 = jax.random.uniform(k_w2, (hidden_dim, 1), jnp.float32, -lim2, lim2)
    b2 = jax.random.uniform(k_b2, (1, 1), jnp.float32, -lim2, lim2)

    tokens = jax.random.randint(k_tok, (batch, sent_len), 0, vocab_size, jnp.int32)

    # jit so the tiny weight-fold / token-shift plumbing + kernel are one dispatch.
    fwd = jax.jit(network_forward)
    out = jax.block_until_ready(fwd(tokens, embed_table, w1, b1, w2, b2))

    # Pure f32 JAX reference of the original (window-duplicated) formulation.
    win_idx = jnp.arange(nw)[:, None] + jnp.arange(fw)[None, :]
    x_ref = embed_table[tokens[:, win_idx]].reshape(batch, nw, in_dim)
    ref = jax.nn.sigmoid(jnp.tanh(x_ref @ w1 + b1) @ w2 + b2).reshape(batch, nw)

    assert out.shape == (batch, nw), out.shape
    assert jnp.allclose(out, ref, atol=5e-3), (
        "mismatch vs reference: max abs err = "
        f"{float(jnp.max(jnp.abs(out - ref)))}")

    print("KERNEL_OK")
</pallas_src>

<mosaic_0001>
module attributes {stable_mosaic.version = 11 : i64} {
  func.func @_window_mlp_kernel(%arg0: i32, %arg1: memref<1x5x128xi32, #tpu.memory_space<vmem>>, %arg2: memref<32x320xbf16, #tpu.memory_space<vmem>>, %arg3: memref<32x1xf32, #tpu.memory_space<vmem>>, %arg4: memref<32x1xf32, #tpu.memory_space<vmem>>, %arg5: memref<1x1xf32, #tpu.memory_space<smem>>, %arg6: memref<1x1x128xf32, #tpu.memory_space<vmem>>) attributes {dimension_semantics = [#tpu.dimension_semantics<parallel>], iteration_bounds = array<i64: 1>, scalar_prefetch = 0 : i64, scratch_operands = 0 : i64, tpu.core_type = #tpu.core_type<tc>, window_params = [{transform_indices = @transform_0, window_bounds = array<i64: 1, 5, 128>}, {pipeline_mode = #tpu.pipeline_mode<synchronous>, transform_indices = @transform_1, window_bounds = array<i64: 32, 320>}, {pipeline_mode = #tpu.pipeline_mode<synchronous>, transform_indices = @transform_2, window_bounds = array<i64: 32, 1>}, {pipeline_mode = #tpu.pipeline_mode<synchronous>, transform_indices = @transform_3, window_bounds = array<i64: 32, 1>}, {transform_indices = @transform_4, window_bounds = array<i64: 1, 1>}, {transform_indices = @transform_5, window_bounds = array<i64: 1, 1, 128>}]} {
    %c0 = arith.constant 0 : index
    %c0_0 = arith.constant 0 : index
    %c0_1 = arith.constant 0 : index
    %0 = vector.load %arg1[%c0, %c0_0, %c0_1] : memref<1x5x128xi32, #tpu.memory_space<vmem>>, vector<1x5x128xi32>
    %1 = vector.shape_cast %0 : vector<1x5x128xi32> to vector<5x128xi32>
    %2 = tpu.iota {dimensions = array<i32: 0>} : vector<64x128xi32>
    %3 = vector.extract_strided_slice %1 {offsets = [0, 0], sizes = [1, 128], strides = [1, 1]} : vector<5x128xi32> to vector<1x128xi32>
    %4 = vector.broadcast %3 : vector<1x128xi32> to vector<64x128xi32>
    %5 = arith.cmpi eq, %2, %4 : vector<64x128xi32>
    %6 = arith.extui %5 : vector<64x128xi1> to vector<64x128xi32>
    %7 = arith.sitofp %6 : vector<64x128xi32> to vector<64x128xf32>
    %8 = arith.truncf %7 : vector<64x128xf32> to vector<64x128xbf16>
    %9 = vector.extract_strided_slice %1 {offsets = [1, 0], sizes = [1, 128], strides = [1, 1]} : vector<5x128xi32> to vector<1x128xi32>
    %10 = vector.broadcast %9 : vector<1x128xi32> to vector<64x128xi32>
    %11 = arith.cmpi eq, %2, %10 : vector<64x128xi32>
    %12 = arith.extui %11 : vector<64x128xi1> to vector<64x128xi32>
    %13 = arith.sitofp %12 : vector<64x128xi32> to vector<64x128xf32>
    %14 = arith.truncf %13 : vector<64x128xf32> to vector<64x128xbf16>
    %15 = vector.extract_strided_slice %1 {offsets = [2, 0], sizes = [1, 128], strides = [1, 1]} : vector<5x128xi32> to vector<1x128xi32>
    %16 = vector.broadcast %15 : vector<1x128xi32> to vector<64x128xi32>
    %17 = arith.cmpi eq, %2, %16 : vector<64x128xi32>
    %18 = arith.extui %17 : vector<64x128xi1> to vector<64x128xi32>
    %19 = arith.sitofp %18 : vector<64x128xi32> to vector<64x128xf32>
    %20 = arith.truncf %19 : vector<64x128xf32> to vector<64x128xbf16>
    %21 = vector.extract_strided_slice %1 {offsets = [3, 0], sizes = [1, 128], strides = [1, 1]} : vector<5x128xi32> to vector<1x128xi32>
    %22 = vector.broadcast %21 : vector<1x128xi32> to vector<64x128xi32>
    %23 = arith.cmpi eq, %2, %22 : vector<64x128xi32>
    %24 = arith.extui %23 : vector<64x128xi1> to vector<64x128xi32>
    %25 = arith.sitofp %24 : vector<64x128xi32> to vector<64x128xf32>
    %26 = arith.truncf %25 : vector<64x128xf32> to vector<64x128xbf16>
    %27 = vector.extract_strided_slice %1 {offsets = [4, 0], sizes = [1, 128], strides = [1, 1]} : vector<5x128xi32> to vector<1x128xi32>
    %28 = vector.broadcast %27 : vector<1x128xi32> to vector<64x128xi32>
    %29 = arith.cmpi eq, %2, %28 : vector<64x128xi32>
    %30 = arith.extui %29 : vector<64x128xi1> to vector<64x128xi32>
    %31 = arith.sitofp %30 : vector<64x128xi32> to vector<64x128xf32>
    %32 = arith.truncf %31 : vector<64x128xf32> to vector<64x128xbf16>
    %33 = tpu.concatenate %8, %14, %20, %26, %32 in 0 : vector<64x128xbf16>, vector<64x128xbf16>, vector<64x128xbf16>, vector<64x128xbf16>, vector<64x128xbf16> -> vector<320x128xbf16>
    %c0_2 = arith.constant 0 : index
    %c0_3 = arith.constant 0 : index
    %34 = vector.load %arg2[%c0_2, %c0_3] : memref<32x320xbf16, #tpu.memory_space<vmem>>, vector<32x320xbf16>
    %cst = arith.constant dense<0.000000e+00> : vector<32x128xf32>
    %35 = tpu.matmul %34, %33, %cst {dimension_numbers = #tpu.dot_dimension_numbers<[1], [0], [0], [1], [0, 0, 1, 1], [], []>} : vector<32x320xbf16>, vector<320x128xbf16>, vector<32x128xf32> -> vector<32x128xf32>
    %c0_4 = arith.constant 0 : index
    %c0_5 = arith.constant 0 : index
    %36 = vector.load %arg3[%c0_4, %c0_5] : memref<32x1xf32, #tpu.memory_space<vmem>>, vector<32x1xf32>
    %37 = vector.broadcast %36 : vector<32x1xf32> to vector<32x128xf32>
    %38 = arith.addf %35, %37 : vector<32x128xf32>
    %39 = math.tanh %38 : vector<32x128xf32>
    %c0_6 = arith.constant 0 : index
    %c0_7 = arith.constant 0 : index
    %40 = vector.load %arg4[%c0_6, %c0_7] : memref<32x1xf32, #tpu.memory_space<vmem>>, vector<32x1xf32>
    %41 = vector.broadcast %40 : vector<32x1xf32> to vector<32x128xf32>
    %42 = arith.mulf %39, %41 : vector<32x128xf32>
    %cst_8 = arith.constant dense<0.000000e+00> : vector<128xf32>
    %43 = vector.multi_reduction <add>, %42, %cst_8 [0] : vector<32x128xf32> to vector<128xf32>
    %44 = vector.shape_cast %43 : vector<128xf32> to vector<1x128xf32>
    %c0_9 = arith.constant 0 : index
    %c0_10 = arith.constant 0 : index
    %45 = memref.load %arg5[%c0_9, %c0_10] : memref<1x1xf32, #tpu.memory_space<smem>>
    %46 = vector.broadcast %45 : f32 to vector<1x128xf32>
    %47 = arith.addf %44, %46 : vector<1x128xf32>
    %48 = arith.negf %47 : vector<1x128xf32>
    %49 = math.exp %48 : vector<1x128xf32>
    %cst_11 = arith.constant 1.000000e+00 : f32
    %50 = vector.broadcast %cst_11 : f32 to vector<1x128xf32>
    %51 = arith.addf %50, %49 : vector<1x128xf32>
    %52 = arith.divf %50, %51 : vector<1x128xf32>
    %c0_12 = arith.constant 0 : index
    %c0_13 = arith.constant 0 : index
    %c0_14 = arith.constant 0 : index
    %53 = vector.load %arg6[%c0_12, %c0_13, %c0_14] : memref<1x1x128xf32, #tpu.memory_space<vmem>>, vector<1x1x128xf32>
    %54 = vector.shape_cast %53 : vector<1x1x128xf32> to vector<1x128xf32>
    %55 = vector.shape_cast %52 : vector<1x128xf32> to vector<1x1x128xf32>
    tpu.vector_store %arg6[%c0_12, %c0_13, %c0_14], %55 {strides = array<i32>} : memref<1x1x128xf32, #tpu.memory_space<vmem>>, vector<1x1x128xf32>,
    return
  }
  func.func @transform_0(%arg0: i32) -> (i32, i32, i32) {
    %c0_i32 = arith.constant 0 : i32
    %c0_i32_0 = arith.constant 0 : i32
    %c0_i32_1 = arith.constant 0 : i32
    return %arg0, %c0_i32, %c0_i32_0 : i32, i32, i32
  }
  func.func @transform_1(%arg0: i32) -> (i32, i32) {
    %c0_i32 = arith.constant 0 : i32
    %c0_i32_0 = arith.constant 0 : i32
    %c0_i32_1 = arith.constant 0 : i32
    return %c0_i32, %c0_i32_0 : i32, i32
  }
  func.func @transform_2(%arg0: i32) -> (i32, i32) {
    %c0_i32 = arith.constant 0 : i32
    %c0_i32_0 = arith.constant 0 : i32
    %c0_i32_1 = arith.constant 0 : i32
    return %c0_i32, %c0_i32_0 : i32, i32
  }
  func.func @transform_3(%arg0: i32) -> (i32, i32) {
    %c0_i32 = arith.constant 0 : i32
    %c0_i32_0 = arith.constant 0 : i32
    %c0_i32_1 = arith.constant 0 : i32
    return %c0_i32, %c0_i32_0 : i32, i32
  }
  func.func @transform_4(%arg0: i32) -> (i32, i32) {
    %c0_i32 = arith.constant 0 : i32
    %c0_i32_0 = arith.constant 0 : i32
    %c0_i32_1 = arith.constant 0 : i32
    return %c0_i32, %c0_i32_0 : i32, i32
  }
  func.func @transform_5(%arg0: i32) -> (i32, i32, i32) {
    %c0_i32 = arith.constant 0 : i32
    %c0_i32_0 = arith.constant 0 : i32
    %c0_i32_1 = arith.constant 0 : i32
    return %arg0, %c0_i32, %c0_i32_0 : i32, i32, i32
  }
}

</mosaic_0001>

<bundles_post_ra>
// kernel: network_forward.1
= control target key start
LH: loop header
LB: loop body
LE: loop exit
PB: predicated region body
PF: predicated region fallthrough
CT: control target
= control target key end

     0   :  { %v23_v0 = vlaneseq  ;;  %v609_v15 = vmov 0.0   ;;  %s868_s0 = inlined_call_operand.vmem [shape: s32[1,5,128], index: 0, kind: input, shape index: {}]   ;;  %s869_s1 = inlined_call_operand.vmem [shape: bf16[32,320], index: 1, kind: input, shape index: {}]   ;;  %s870_s2 = inlined_call_operand.vmem [shape: f32[32,1], index: 2, kind: input, shape index: {}]   ;;  %s871_s3 = inlined_call_operand.vmem [shape: f32[32,1], index: 3, kind: input, shape index: {}]   ;;  %s872_s4 = inlined_call_operand.<no memory space> [shape: f32[1,1], index: 4, kind: input, shape index: {}]   ;;  %s873_s5 = inlined_call_operand.vmem [shape: f32[1,1,128], index: 5, kind: output, shape index: {}]  }
   0x1   :  { %v22_v1 = vld [vmem:[%s868_s0] sm:$0x1f] }
   0x2   :  { %v644_v2 = vshrl.u32 %v23_v0, 7  ;;  %v646_v3 = vperm.slane %v22_v1, 1  ;;  %v648_v4 = vperm.slane %v22_v1, 3  ;;  %v650_v5 = vperm.slane %v22_v1, 4 }
   0x3   :  { %v652_v6 = vperm.slane %v22_v1, 0  ;;  %v663_v10 = vperm.slane %v22_v1, 2 }
   0x4   :  { %v655_v7 = vadd.s32 48, %v644_v2  ;;  %v658_v8 = vadd.s32 56, %v644_v2  ;;  %v661_v9 = vadd.s32 32, %v644_v2  ;;  %v666_v11 = vadd.s32 40, %v644_v2 }
   0x5   :  { %v669_v12 = vadd.s32 16, %v644_v2  ;;  %v672_v13 = vadd.s32 24, %v644_v2  ;;  %v675_v14 = vadd.s32 8, %v644_v2  ;;  %vm66_vm8 = vcmp.eq.s32.totalorder %v644_v2, %v646_v3 }
   0x6   :  { %vm72_vm0 = vcmp.eq.s32.totalorder %v655_v7, %v646_v3  ;;  %vm73_vm1 = vcmp.eq.s32.totalorder %v658_v8, %v646_v3  ;;  %vm138_vm2 = vcmp.eq.s32.totalorder %v655_v7, %v648_v4  ;;  %vm139_vm3 = vcmp.eq.s32.totalorder %v658_v8, %v648_v4 }
   0x7   :  { %v525_v16 = vsel %vm72_vm0, 1.0, %v609_v15  ;;  %v526_v17 = vsel %vm73_vm1, 1.0, %v609_v15  ;;  %v541_v18 = vsel %vm138_vm2, 1.0, %v609_v15  ;;  %v542_v19 = vsel %vm139_vm3, 1.0, %v609_v15 }
   0x8   :  { %v96_v20 = vpack.c.bf16 %v525_v16, %v525_v16  ;;  %v97_v21 = vpack.c.bf16 %v526_v17, %v526_v17  ;;  %v162_v22 = vpack.c.bf16 %v541_v18, %v541_v18  ;;  %v163_v23 = vpack.c.bf16 %v542_v19, %v542_v19 }
   0x9   :  { %vm70_vm4 = vcmp.eq.s32.totalorder %v661_v9, %v646_v3  ;;  %vm71_vm5 = vcmp.eq.s32.totalorder %v666_v11, %v646_v3  ;;  %vm136_vm6 = vcmp.eq.s32.totalorder %v661_v9, %v648_v4  ;;  %vm137_vm7 = vcmp.eq.s32.totalorder %v666_v11, %v648_v4 }
   0xa   :  { %v235_v24 = vunpack.c.l.b16 %v96_v20  ;;  %v236_v25 = vunpack.c.l.b16 %v97_v21  ;;  %v283_v26 = vunpack.c.l.b16 %v162_v22  ;;  %v284_v27 = vunpack.c.l.b16 %v163_v23 }
   0xb   :  { %v523_v28 = vsel %vm70_vm4, 1.0, %v609_v15  ;;  %v524_v29 = vsel %vm71_vm5, 1.0, %v609_v15  ;;  %v539_v30 = vsel %vm136_vm6, 1.0, %v609_v15  ;;  %v540_v31 = vsel %vm137_vm7, 1.0, %v609_v15 }
   0xc   :  { %v240_v32 = vpack.c.b16 %v236_v25, %v235_v24  ;;  %v288_v33 = vpack.c.b16 %v284_v27, %v283_v26  ;;  %v94_v34 = vpack.c.bf16 %v523_v28, %v523_v28  ;;  %v95_v35 = vpack.c.bf16 %v524_v29, %v524_v29 }
   0xd   :  { %v160_v36 = vpack.c.bf16 %v539_v30, %v539_v30  ;;  %v161_v37 = vpack.c.bf16 %v540_v31, %v540_v31  ;;  %vm171_vm9 = vcmp.eq.s32.totalorder %v655_v7, %v650_v5  ;;  %vm172_vm10 = vcmp.eq.s32.totalorder %v658_v8, %v650_v5 }
   0xe   :  { %386 = vmatpush.bf16.msra.mxu0 %v240_v32  ;;  %584 = vmatpush.bf16.msra.mxu3 %v240_v32  ;;  %v233_v38 = vunpack.c.l.b16 %v94_v34  ;;  %v234_v39 = vunpack.c.l.b16 %v95_v35  ;;  %v549_v40 = vsel %vm171_vm9, 1.0, %v609_v15  ;;  %v550_v41 = vsel %vm172_vm10, 1.0, %v609_v15 }
   0xf   :  { %405 = vmatpush.bf16.msra.mxu1 %v288_v33  ;;  %v281_v42 = vunpack.c.l.b16 %v160_v36  ;;  %v282_v43 = vunpack.c.l.b16 %v161_v37  ;;  %v195_v44 = vpack.c.bf16 %v549_v40, %v549_v40  ;;  %v196_v45 = vpack.c.bf16 %v550_v41, %v550_v41 }
  0x10   :  { %v239_v46 = vpack.c.b16 %v234_v39, %v233_v38  ;;  %vm68_vm11 = vcmp.eq.s32.totalorder %v669_v12, %v646_v3  ;;  %vm69_vm12 = vcmp.eq.s32.totalorder %v672_v13, %v646_v3  ;;  %vm134_vm13 = vcmp.eq.s32.totalorder %v669_v12, %v648_v4 }
  0x11   :  { %v287_v47 = vpack.c.b16 %v282_v43, %v281_v42  ;;  %v307_v48 = vunpack.c.l.b16 %v195_v44  ;;  %v308_v49 = vunpack.c.l.b16 %v196_v45  ;;  %v521_v50 = vsel %vm68_vm11, 1.0, %v609_v15  ;;  %v580_v45 = vld [vmem:[%s869_s1 + $0x10] sm:$0xf0] }
  0x12   :  { %387 = vmatpush.bf16.msra.mxu0 %v239_v46  ;;  %585 = vmatpush.bf16.msra.mxu3 %v239_v46  ;;  %v522_v51 = vsel %vm69_vm12, 1.0, %v609_v15  ;;  %v92_v52 = vpack.c.bf16 %v521_v50, %v521_v50  ;;  %vm135_vm14 = vcmp.eq.s32.totalorder %v672_v13, %v648_v4  ;;  %v537_v53 = vsel %vm134_vm13, 1.0, %v609_v15 }
  0x13   :  { %406 = vmatpush.bf16.msra.mxu1 %v287_v47  ;;  %v312_v54 = vpack.c.b16 %v308_v49, %v307_v48  ;;  %v93_v55 = vpack.c.bf16 %v522_v51, %v522_v51  ;;  %v538_v56 = vsel %vm135_vm14, 1.0, %v609_v15  ;;  %v158_v57 = vpack.c.bf16 %v537_v53, %v537_v53 }
  0x14   :  { %v231_v58 = vunpack.c.l.b16 %v92_v52  ;;  %v159_v59 = vpack.c.bf16 %v538_v56, %v538_v56  ;;  %vm169_vm15 = vcmp.eq.s32.totalorder %v661_v9, %v650_v5  ;;  %vm170_vm0 = vcmp.eq.s32.totalorder %v666_v11, %v650_v5 }
  0x15   :  { %428 = vmatpush.bf16.msra.mxu2 %v312_v54  ;;  %v232_v60 = vunpack.c.l.b16 %v93_v55  ;;  %v279_v61 = vunpack.c.l.b16 %v158_v57  ;;  %v547_v62 = vsel %vm169_vm15, 1.0, %v609_v15  ;;  %v548_v63 = vsel %vm170_vm0, 1.0, %v609_v15 }
  0x16   :  { %v280_v0 = vunpack.c.l.b16 %v159_v59  ;;  %v193_v1 = vpack.c.bf16 %v547_v62, %v547_v62  ;;  %v194_v16 = vpack.c.bf16 %v548_v63, %v548_v63  ;;  %vm67_vm1 = vcmp.eq.s32.totalorder %v675_v14, %v646_v3 }
  0x17   :  { %v238_v17 = vpack.c.b16 %v232_v60, %v231_v58  ;;  %v519_v18 = vsel %vm66_vm8, 1.0, %v609_v15  ;;  %v520_v19 = vsel %vm67_vm1, 1.0, %v609_v15  ;;  %vm132_vm2 = vcmp.eq.s32.totalorder %v644_v2, %v648_v4 }
  0x18   :  { %v286_v20 = vpack.c.b16 %v280_v0, %v279_v61  ;;  %v305_v21 = vunpack.c.l.b16 %v193_v1  ;;  %v306_v22 = vunpack.c.l.b16 %v194_v16  ;;  %v90_v23 = vpack.c.bf16 %v519_v18, %v519_v18 }
  0x19   :  { %388 = vmatpush.bf16.msra.mxu0 %v238_v17  ;;  %586 = vmatpush.bf16.msra.mxu3 %v238_v17  ;;  %v91_v24 = vpack.c.bf16 %v520_v19, %v520_v19  ;;  %vm133_vm3 = vcmp.eq.s32.totalorder %v675_v14, %v648_v4  ;;  %v535_v25 = vsel %vm132_vm2, 1.0, %v609_v15  ;;  %vm167_vm4 = vcmp.eq.s32.totalorder %v669_v12, %v650_v5 }
  0x1a   :  { %407 = vmatpush.bf16.msra.mxu1 %v286_v20  ;;  %v311_v3 = vpack.c.b16 %v306_v22, %v305_v21  ;;  %v229_v26 = vunpack.c.l.b16 %v90_v23  ;;  %v536_v27 = vsel %vm133_vm3, 1.0, %v609_v15  ;;  %v156_v28 = vpack.c.bf16 %v535_v25, %v535_v25 }
  0x1b   :  { %v230_v29 = vunpack.c.l.b16 %v91_v24  ;;  %v157_v30 = vpack.c.bf16 %v536_v27, %v536_v27  ;;  %vm168_vm5 = vcmp.eq.s32.totalorder %v672_v13, %v650_v5  ;;  %v545_v31 = vsel %vm167_vm4, 1.0, %v609_v15 }
  0x1c   :  { %429 = vmatpush.bf16.msra.mxu2 %v311_v3  ;;  %v277_v4 = vunpack.c.l.b16 %v156_v28  ;;  %v546_v32 = vsel %vm168_vm5, 1.0, %v609_v15  ;;  %v191_v33 = vpack.c.bf16 %v545_v31, %v545_v31  ;;  %vm39_vm6 = vcmp.eq.s32.totalorder %v655_v7, %v652_v6 }
  0x1d   :  { %v237_v34 = vpack.c.b16 %v230_v29, %v229_v26  ;;  %v278_v35 = vunpack.c.l.b16 %v157_v30  ;;  %v192_v36 = vpack.c.bf16 %v546_v32, %v546_v32  ;;  %vm40_vm7 = vcmp.eq.s32.totalorder %v658_v8, %v652_v6 }
  0x1e   :  { %v303_v37 = vunpack.c.l.b16 %v191_v33  ;;  %v517_v38 = vsel %vm39_vm6, 1.0, %v609_v15  ;;  %v518_v39 = vsel %vm40_vm7, 1.0, %v609_v15  ;;  %vm105_vm8 = vcmp.eq.s32.totalorder %v655_v7, %v663_v10  ;;  %v561_v7 = vld [vmem:[%s869_s1 + $0x8] sm:$0xf] }
  0x1f   :  { %389 = vmatpush.bf16.msra.mxu0 %v237_v34  ;;  %587 = vmatpush.bf16.msra.mxu3 %v237_v34  ;;  %v285_v40 = vpack.c.b16 %v278_v35, %v277_v4  ;;  %v304_v41 = vunpack.c.l.b16 %v192_v36  ;;  %v63_v42 = vpack.c.bf16 %v517_v38, %v517_v38  ;;  %v64_v43 = vpack.c.bf16 %v518_v39, %v518_v39  ;;  %v325_v38 = vld [vmem:[%s870_s2] sm:$0xff] }
  0x20   :  { %vm106_vm9 = vcmp.eq.s32.totalorder %v658_v8, %v663_v10  ;;  %v533_v44 = vsel %vm105_vm8, 1.0, %v609_v15  ;;  %vm165_vm10 = vcmp.eq.s32.totalorder %v644_v2, %v650_v5  ;;  %vm166_vm11 = vcmp.eq.s32.totalorder %v675_v14, %v650_v5  ;;  %v553_v39 = vld [vmem:[%s869_s1] sm:$0xf] }
  0x21   :  { %408 = vmatpush.bf16.msra.mxu1 %v285_v40  ;;  %v310_v46 = vpack.c.b16 %v304_v41, %v303_v37  ;;  %v211_v47 = vunpack.c.l.b16 %v63_v42  ;;  %v212_v8 = vunpack.c.l.b16 %v64_v43  ;;  %v534_v48 = vsel %vm106_vm9, 1.0, %v609_v15  ;;  %v579_v40 = vld [vmem:[%s869_s1 + $0x8] sm:$0xf0]  ;;  %v565_v43 = vld [vmem:[%s869_s1 + $0x18] sm:$0xf] }
  0x22   :  { %v129_v49 = vpack.c.bf16 %v533_v44, %v533_v44  ;;  %v130_v50 = vpack.c.bf16 %v534_v48, %v534_v48  ;;  %v543_v51 = vsel %vm165_vm10, 1.0, %v609_v15  ;;  %v544_v5 = vsel %vm166_vm11, 1.0, %v609_v15  ;;  %v582_v44 = vld [vmem:[%s869_s1 + $0x20] sm:$0xf0]  ;;  %v555_v48 = vld [vmem:[%s869_s1 + $0xc] sm:$0xf0] }
  0x23   :  { %430 = vmatpush.bf16.msra.mxu2 %v310_v46  ;;  %v216_v52 = vpack.c.b16 %v212_v8, %v211_v47  ;;  %v189_v53 = vpack.c.bf16 %v543_v51, %v543_v51  ;;  %v190_v54 = vpack.c.bf16 %v544_v5, %v544_v5  ;;  %v562_v55 = vor.u32 %v580_v45, %v561_v7  ;;  %v447_v45 = vld [vmem:[%s871_s3] sm:$0xff] }
  0x24   :  { %v259_v56 = vunpack.c.l.b16 %v129_v49  ;;  %v260_v57 = vunpack.c.l.b16 %v130_v50  ;;  %vm379_vm12 = vcmask 523264   ;;  %vm37_vm13 = vcmp.eq.s32.totalorder %v661_v9, %v652_v6  ;;  %v578_v8 = vld [vmem:[%s869_s1 + $0x4] sm:$0xf] }
  0x25   :  { %390 = vmatpush.bf16.msra.mxu0 %v216_v52  ;;  %588 = vmatpush.bf16.msra.mxu3 %v216_v52  ;;  %v301_v58 = vunpack.c.l.b16 %v189_v53  ;;  %v302_v59 = vunpack.c.l.b16 %v190_v54  ;;  %vm38_vm14 = vcmp.eq.s32.totalorder %v666_v11, %v652_v6  ;;  %v515_v60 = vsel %vm37_vm13, 1.0, %v609_v15  ;;  %v573_v52 = vld [vmem:[%s869_s1 + $0x20] sm:$0xf]  ;;  %v583_v53 = vld [vmem:[%s869_s1 + $0x28] sm:$0xf0] }
  0x26   :  { %v264_v61 = vpack.c.b16 %v260_v57, %v259_v56  ;;  %v516_v62 = vsel %vm38_vm14, 1.0, %v609_v15  ;;  %v61_v63 = vpack.c.bf16 %v515_v60, %v515_v60  ;;  %vm103_vm15 = vcmp.eq.s32.totalorder %v661_v9, %v663_v10  ;;  %v326_v56 = vld [vmem:[%s870_s2 + $0x8] sm:$0xff]  ;;  %v328_v57 = vld [vmem:[%s870_s2 + $0x18] sm:$0xff] }
  0x27   :  { %v309_v0 = vpack.c.b16 %v302_v59, %v301_v58  ;;  %v62_v1 = vpack.c.bf16 %v516_v62, %v516_v62  ;;  %vm104_vm0 = vcmp.eq.s32.totalorder %v666_v11, %v663_v10  ;;  %v531_v16 = vsel %vm103_vm15, 1.0, %v609_v15  ;;  %v448_v58 = vld [vmem:[%s871_s3 + $0x8] sm:$0xff]  ;;  %v449_v59 = vld [vmem:[%s871_s3 + $0x10] sm:$0xff]  ;;  %v450_v60 = vld [vmem:[%s871_s3 + $0x18] sm:$0xff] }
  0x28   :  { %409 = vmatpush.bf16.msra.mxu1 %v264_v61  ;;  %v209_v17 = vunpack.c.l.b16 %v61_v63  ;;  %v532_v18 = vsel %vm104_vm0, 1.0, %v609_v15  ;;  %v127_v19 = vpack.c.bf16 %v531_v16, %v531_v16  ;;  %vm35_vm1 = vcmp.eq.s32.totalorder %v669_v12, %v652_v6  ;;  %v581_v61 = vld [vmem:[%s869_s1 + $0x1c] sm:$0xf]  ;;  %v567_v62 = vld [vmem:[%s869_s1 + $0x24] sm:$0xf0] }
  0x29   :  { %431 = vmatpush.bf16.msra.mxu2 %v309_v0  ;;  %v210_v20 = vunpack.c.l.b16 %v62_v1  ;;  %v128_v21 = vpack.c.bf16 %v532_v18, %v532_v18  ;;  %vm36_vm2 = vcmp.eq.s32.totalorder %v672_v13, %v652_v6  ;;  %v513_v9 = vsel %vm35_vm1, 1.0, %v609_v15 }
  0x2a   :  { %v257_v22 = vunpack.c.l.b16 %v127_v19  ;;  %v514_v11 = vsel %vm36_vm2, 1.0, %v609_v15  ;;  %v59_v23 = vpack.c.bf16 %v513_v9, %v513_v9  ;;  %vm101_vm3 = vcmp.eq.s32.totalorder %v669_v12, %v663_v10 }
  0x2b   :  { %v215_v24 = vpack.c.b16 %v210_v20, %v209_v17  ;;  %v258_v25 = vunpack.c.l.b16 %v128_v21  ;;  %v60_v3 = vpack.c.bf16 %v514_v11, %v514_v11  ;;  %vm102_vm4 = vcmp.eq.s32.totalorder %v672_v13, %v663_v10 }
  0x2c   :  { %575 = vmatmul.msk.bf16.vlgmr.msra.gmra.mxu2 %vm379_vm12, %v562_v55  ;;  %v207_v26 = vunpack.c.l.b16 %v59_v23  ;;  %v529_v27 = vsel %vm101_vm3, 1.0, %v609_v15  ;;  %v530_v28 = vsel %vm102_vm4, 1.0, %v609_v15  ;;  %vm33_vm5 = vcmp.eq.s32.totalorder %v644_v2, %v652_v6 }
  0x2d   :  { %391 = vmatpush.bf16.msra.mxu0 %v215_v24  ;;  %589 = vmatpush.bf16.msra.mxu3 %v215_v24  ;;  %v263_v29 = vpack.c.b16 %v258_v25, %v257_v22  ;;  %v208_v12 = vunpack.c.l.b16 %v60_v3  ;;  %v125_v30 = vpack.c.bf16 %v529_v27, %v529_v27  ;;  %v126_v31 = vpack.c.bf16 %v530_v28, %v530_v28 }
  0x2e   :  { %vm34_vm6 = vcmp.eq.s32.totalorder %v675_v14, %v652_v6  ;;  %v511_v13 = vsel %vm33_vm5, 1.0, %v609_v15  ;;  %vm99_vm7 = vcmp.eq.s32.totalorder %v644_v2, %v663_v10  ;;  %vm100_vm8 = vcmp.eq.s32.totalorder %v675_v14, %v663_v10 }
  0x2f   :  { %410 = vmatpush.bf16.msra.mxu1 %v263_v29  ;;  %v214_v4 = vpack.c.b16 %v208_v12, %v207_v26  ;;  %v255_v32 = vunpack.c.l.b16 %v125_v30  ;;  %v256_v33 = vunpack.c.l.b16 %v126_v31  ;;  %v512_v34 = vsel %vm34_vm6, 1.0, %v609_v15 }
  0x30   :  { %v57_v35 = vpack.c.bf16 %v511_v13, %v511_v13  ;;  %v58_v36 = vpack.c.bf16 %v512_v34, %v512_v34  ;;  %v527_v37 = vsel %vm99_vm7, 1.0, %v609_v15  ;;  %v528_v6 = vsel %vm100_vm8, 1.0, %v609_v15  ;;  %v327_v15 = vld [vmem:[%s870_s2 + $0x10] sm:$0xff] }
  0x31   :  { %392 = vmatpush.bf16.msra.mxu0 %v214_v4  ;;  %590 = vmatpush.bf16.msra.mxu3 %v214_v4  ;;  %v262_v2 = vpack.c.b16 %v256_v33, %v255_v32  ;;  %v123_v10 = vpack.c.bf16 %v527_v37, %v527_v37  ;;  %v124_v14 = vpack.c.bf16 %v528_v6, %v528_v6  ;;  %v610_v7 = vmov 0  }
  0x32   :  { %v205_v41 = vunpack.c.l.b16 %v57_v35  ;;  %v206_v42 = vunpack.c.l.b16 %v58_v36  ;;  %594 = vset.pattern.permute.xlu0 %v610_v7  ;;  %595 = vset.pattern.permute.xlu1 %v610_v7  ;;  %v554_v51 = vor.u32 %v579_v40, %v553_v39  ;;  %v566_v5 = vor.u32 %v582_v44, %v565_v43 }
  0x33   :  { %411 = vmatpush.bf16.msra.mxu1 %v262_v2  ;;  %v253_v46 = vunpack.c.l.b16 %v123_v10  ;;  %v254_v47 = vunpack.c.l.b16 %v124_v14  ;;  %331 = vperm.xlu0 %594, %v325_v38   ;;  %v558_v54 = vor.u32 %v578_v8, %v555_v48  ;;  %v574_v55 = vor.u32 %v583_v53, %v573_v52 }
  0x34   :  { %v213_v49 = vpack.c.b16 %v206_v42, %v205_v41  ;;  %341 = vperm.xlu1 %595, %v327_v15   ;;  %596 = vset.pattern.permute.xlu2 %v610_v7  ;;  %v570_v63 = vor.u32 %v581_v61, %v567_v62 }
  0x35   :  { %v261_v50 = vpack.c.b16 %v254_v47, %v253_v46  ;;  %453 = vperm.xlu2 %596, %v447_v45  }
  0x36   :  { %393 = vmatpush.bf16.msra.mxu0 %v213_v49  ;;  %591 = vmatpush.bf16.msra.mxu3 %v213_v49  ;;  %v485_v49 = vstv %s872_s4 }
  0x37   :  { %412 = vmatpush.bf16.msra.mxu1 %v261_v50 }
  0x39   :  { %394 = vmatmul.bf16.vlgmr.msra.gmra.mxu0 %v554_v51  ;;  %399 = vmatmul.bf16.vlgmr.msra.gmra.mxu3 %v566_v5 }
  0x3a   :  { %413 = vmatmul.bf16.vlgmr.msra.gmra.mxu1 %v558_v54 }
  0x3b   :  { %336 = vperm.xlu0 %594, %v326_v56  }
  0x3c   :  { %576 = vmatmul.msk.bf16.gmra.mxu2 %vm379_vm12, %v574_v55  ;;  %346 = vperm.xlu1 %595, %v328_v57  }
  0x3d   :  { %458 = vperm.xlu2 %596, %v448_v58  }
  0x43   :  { %463 = vperm.xlu0 %594, %v449_v59  }
  0x44   :  { %468 = vperm.xlu1 %595, %v450_v60  }
  0x4a   :  { %418 = vmatmul.bf16.gmra.mxu1 %v570_v63 }
  0x8f   :  { %v454_v29 = vpop.permute.xlu2 %453 }
  0x97   :  { %v459_v37 = vpop.permute.xlu2 %458 }
  0xa5   :  { %v332_v1 = vpop.permute.xlu0 %331 }
  0xa6   :  { %v342_v23 = vpop.permute.xlu1 %341 }
  0xad   :  { %v337_v20 = vpop.permute.xlu0 %336 }
  0xae   :  { %v347_v4 = vpop.permute.xlu1 %346 }
  0xaf   :  { %v433_v0 = vpop.f32.mrf.mxu2 }
  0xb5   :  { %v464_v14 = vpop.permute.xlu0 %463 }
  0xb6   :  { %v395_v16 = vpop.f32.mrf.mxu0  ;;  %v469_v42 = vpop.permute.xlu1 %468 }
  0xb7   :  { %v414_v17 = vpop.f32.mrf.mxu1  ;;  %v435_v18 = vpop.f32.mrf.mxu2  ;;  %v396_v22 = vadd.f32 %v395_v16, %v332_v1 }
  0xb9   :  { %v415_v3 = vadd.f32 %v414_v17, %v396_v22 }
  0xbb   :  { %v434_v30 = vadd.f32 %v433_v0, %v415_v3 }
  0xbc   :  { %v400_v11 = vpop.f32.mrf.mxu3 }
  0xbd   :  { %v401_v24 = vadd.f32 %v400_v11, %v342_v23 }
  0xbe   :  { %v397_v19 = vpop.f32.mrf.mxu0 }
  0xbf   :  { %v416_v21 = vpop.f32.mrf.mxu1  ;;  %v398_v9 = vadd.f32 %v397_v19, %v337_v20  ;;  %v438_v26 = vpop.f32.mrf.mxu2 }
  0xc1   :  { %v417_v25 = vadd.f32 %v416_v21, %v398_v9 }
  0xc3   :  { %v436_v28 = vadd.f32 %v435_v18, %v417_v25 }
  0xc4   :  { %v402_v13 = vpop.f32.mrf.mxu3 }
  0xc5   :  { %597 = vtanh.f32 %v436_v28  ;;  %v403_v32 = vadd.f32 %v402_v13, %v347_v4 }
  0xc6   :  { %599 = vtanh.f32 %v434_v30 }
  0xc7   :  { %v419_v27 = vpop.f32.mrf.mxu1  ;;  %v440_v35 = vpop.f32.mrf.mxu2 }
  0xc8   :  { %v420_v12 = vadd.f32 %v419_v27, %v401_v24 }
  0xca   :  { %v439_v31 = vadd.f32 %v438_v26, %v420_v12 }
  0xcb   :  { %v598_v36 = vpop.eup %597 }
  0xcc   :  { %601 = vtanh.f32 %v439_v31  ;;  %v600_v38 = vpop.eup %599  ;;  %v472_v10 = vmul.f32 %v598_v36, %v459_v37 }
  0xcd   :  { %v471_v39 = vmul.f32 %v600_v38, %v454_v29 }
  0xcf   :  { %v421_v33 = vpop.f32.mrf.mxu1  ;;  %v475_v15 = vadd.f32 %v472_v10, %v471_v39 }
  0xd0   :  { %v422_v34 = vadd.f32 %v421_v33, %v403_v32 }
  0xd2   :  { %v441_v6 = vadd.f32 %v440_v35, %v422_v34  ;;  %v602_v2 = vpop.eup %601 }
  0xd3   :  { %v473_v40 = vmul.f32 %v602_v2, %v464_v14 }
  0xd4   :  { %603 = vtanh.f32 %v441_v6 }
  0xd5   :  { %v476_v43 = vadd.f32 %v475_v15, %v473_v40 }
  0xda   :  { %v604_v41 = vpop.eup %603 }
  0xdb   :  { %v474_v44 = vmul.f32 %v604_v41, %v469_v42 }
  0xdd   :  { %v477_v7 = vadd.f32 %v476_v43, %v474_v44 }
  0xdf   :  { %v478_v45 = vrot.slane %v477_v7, 4 }
  0xe1   :  { %v479_v46 = vadd.f32 %v478_v45, %v477_v7 }
  0xe3   :  { %v480_v47 = vrot.slane %v479_v46, 2 }
  0xe5   :  { %v481_v8 = vadd.f32 %v480_v47, %v479_v46 }
  0xe7   :  { %v482_v48 = vrot.slane %v481_v8, 1 }
  0xe9   :  { %v483_v50 = vadd.f32 %v482_v48, %v481_v8 }
  0xeb   :  { %v486_v51 = vadd.f32 %v485_v49, %v483_v50 }
  0xed   :  { %v577_v5 = vmul.f32 -1.442695, %v486_v51 }
  0xef   :  { %605 = vpow2.f32 %v577_v5 }
  0xf5   :  { %v606_v52 = vpop.eup %605 }
  0xf6   :  { %v490_v53 = vadd.f32 1.0, %v606_v52 }
  0xf8   :  { %607 = vrcp.f32 %v490_v53  ;;  %v502_v57 = vand.u32 2147483648, %v490_v53  ;;  %v500_v59 = vand.u32 2147483647, %v490_v53  ;;  %vm496_vm10 = vweird.f32 %v490_v53 }
  0xfa   :  { %v503_v61 = vor.u32 1.1754944e-38, %v502_v57  ;;  %vm501_vm12 = vcmp.eq.f32.partialorder %v500_v59, 8.507059e+37 }
  0xfe   :  { %v608_v54 = vpop.eup %607 }
  0xff   :  { %v492_v55 = vmul.f32 %v608_v54, %v490_v53  ;;  %vm497_vm9 = vweird.f32 %v608_v54 }
 0x100   :  { %vm498_vm11 = vmor %vm496_vm10, %vm497_vm9 }
 0x101   :  { %v493_v56 = vsub.f32 1.0, %v492_v55 }
 0x103   :  { %v494_v58 = vmul.f32 %v608_v54, %v493_v56 }
 0x105   :  { %v495_v60 = vadd.f32 %v608_v54, %v494_v58 }
 0x107   :  { %v499_v62 = vsel %vm498_vm11, %v608_v54, %v495_v60 }
 0x108   :  { %v504_v63 = vsel %vm501_vm12, %v503_v61, %v499_v62 }
 0x109   :  { %506 = vst [vmem:[%s873_s5] sm:$0x1] %v504_v63 }

</bundles_post_ra>
